<compile_context>
chip_gen: v7x
topology: tpu7x:2x2x1
jax: 0.10.0
libtpu: 0.0.40
codegen_flags: <defaults>
</compile_context>

<pallas_src>
import jax
import jax.numpy as jnp
from jax.experimental import pallas as pl
from jax.experimental.pallas import tpu as pltpu


# Tile caps shared by weight prep and the forward pass (must agree so the
# pre-padded mat divides evenly into tiles).
TM_MAX = 512      # keep grid[0] == 1 for B <= 512  -> mat read exactly once
TN_MAX = 1024
TK_MAX = 1024
VMEM_LIMIT_BYTES = 48 * 1024 * 1024   # v7x-safe (64 MiB physical per TC)


def _round_up(x: int, m: int) -> int:
    return (x + m - 1) // m * m


def _base_tiles(N: int, M: int):
    """Reduction / output-column tiles (lane-dense multiples of 128)."""
    tk = min(TK_MAX, _round_up(N, 128))
    tn = min(TN_MAX, _round_up(M, 128))
    return tk, tn


def prepare_mat(mat):
    """One-time weight prep: zero-pad to tile multiples and cast to bf16.

    Do this once (e.g. at parameter-load time) and cache the result; it keeps
    the full N*M copy + cast out of the per-forward hot path.
    """
    N, M = mat.shape
    tk, tn = _base_tiles(N, M)
    N_p, M_p = _round_up(N, tk), _round_up(M, tn)
    if (N_p, M_p) == (N, M):
        return mat.astype(jnp.bfloat16)
    out = jnp.zeros((N_p, M_p), jnp.bfloat16)
    return out.at[:N, :M].set(mat.astype(jnp.bfloat16))


def sparse_model_kernel(rate_ref, sw_ref, mat_ref, o_ref):
    # rate_ref: (tm, tk) f32   sw_ref: (1, tk) f32
    # mat_ref:  (tk, tn) bf16  o_ref:  (tm, tn) f32 (resident across k)
    k = pl.program_id(2)

    @pl.when(k == 0)
    def _init():
        o_ref[...] = jnp.zeros_like(o_ref)

    gate = jax.nn.sigmoid(sw_ref[...])                   # (1, tk)  EUP
    a = (rate_ref[...] * gate).astype(jnp.bfloat16)      # (tm, tk) VPU + cast
    # MXU: bf16 x bf16 -> f32 accumulation directly into the output block.
    o_ref[...] += jnp.dot(a, mat_ref[...], preferred_element_type=jnp.float32)


def sparse_model_forward(rate, sparse_weight, mat_prepared, N, M):
    """rate: (B, N) f32, sparse_weight: (N,) f32,
    mat_prepared: (N_p, M_p) bf16 from `prepare_mat`  ->  (B, M) f32."""
    B, Nr = rate.shape
    assert Nr == N and sparse_weight.shape == (N,)
    N_p, M_p = mat_prepared.shape

    tk, tn = _base_tiles(N, M)
    assert N_p % tk == 0 and M_p % tn == 0, "mat not prepared with matching tiles"

    tm = min(TM_MAX, _round_up(B, 8))
    B_p = _round_up(B, tm)

    # v7x (2 TensorCores): if B fits in one tile, try to expose >= 2 parallel
    # M tiles.  Only split when the halved tile stays a lane-dense multiple of
    # 128 (so it still divides M_p).  Near-neutral on single-TC v5e/v6e.
    if B_p == tm and M_p // tn < 2 and tn % 256 == 0:
        tn //= 2

    # Per-call padding of the small operands only.
    rate_in = rate
    if (B_p, N_p) != (B, N):
        rate_in = jnp.zeros((B_p, N_p), rate.dtype).at[:B, :N].set(rate)
    if N_p != N:
        sw_in = jnp.zeros((1, N_p), sparse_weight.dtype).at[0, :N].set(sparse_weight)
    else:
        sw_in = sparse_weight.reshape(1, N_p)
    # Padded rate columns are zero, so sigmoid(0)=0.5 on padded N positions
    # contributes nothing to the dot product.

    grid = (B_p // tm, M_p // tn, N_p // tk)

    # Advisory cost estimate (mat is bf16 = 2 B/elem; re-read per B tile).
    flops = 2 * B_p * N_p * M_p
    transcendentals = grid[0] * grid[1] * N_p
    bytes_accessed = (
        4 * B_p * N_p * grid[1]          # rate tiles, re-read per M tile
        + 4 * N_p * grid[0] * grid[1]    # gate tiles
        + 2 * N_p * M_p * grid[0]        # bf16 mat tiles, re-read per B tile
        + 4 * B_p * M_p                  # f32 output writeback
    )

    out_p = pl.pallas_call(
        sparse_model_kernel,
        out_shape=jax.ShapeDtypeStruct((B_p, M_p), jnp.float32),
        grid_spec=pl.GridSpec(
            grid=grid,
            in_specs=[
                pl.BlockSpec((tm, tk), lambda i, j, k: (i, k)),   # rate
                pl.BlockSpec((1, tk), lambda i, j, k: (0, k)),    # sparse_weight
                pl.BlockSpec((tk, tn), lambda i, j, k: (k, j)),   # mat (bf16)
            ],
            out_specs=pl.BlockSpec((tm, tn), lambda i, j, k: (i, j)),
        ),
        compiler_params=pltpu.CompilerParams(
            dimension_semantics=("parallel", "parallel", "arbitrary"),
            vmem_limit_bytes=VMEM_LIMIT_BYTES,
        ),
        cost_estimate=pl.CostEstimate(
            flops=flops,
            transcendentals=transcendentals,
            bytes_accessed=bytes_accessed,
        ),
    )(rate_in, sw_in, mat_prepared)

    return out_p[:B, :M]


if __name__ == "__main__":
    # Small shapes consistent with the module: mat (N, M), sparse_weight (N,), rate (B, N)
    B, N, M = 8, 32, 128

    key = jax.random.PRNGKey(0)
    k_mat, k_sw, k_rate = jax.random.split(key, 3)

    mat = jax.random.normal(k_mat, (N, M), dtype=jnp.float32)
    sparse_weight = jax.random.uniform(
        k_sw, (N,), minval=1.0, maxval=2.0, dtype=jnp.float32
    )
    rate = jax.random.normal(k_rate, (B, N), dtype=jnp.float32)

    # One-time weight prep (pad + bf16 cast), then the hot-path forward.
    mat_prepared = jax.block_until_ready(prepare_mat(mat))

    out = sparse_model_forward(rate, sparse_weight, mat_prepared, N, M)
    out = jax.block_until_ready(out)
    assert out.shape == (B, M)

    # PyTorch semantics reference: x = (rate * sigmoid(sparse_weight)) @ mat
    gate = jax.nn.sigmoid(sparse_weight)[None, :]
    ref_f32 = (rate * gate) @ mat
    # What the MXU computes: bf16 operands, f32 accumulation.
    ref_bf16 = (
        (rate * gate).astype(jnp.bfloat16).astype(jnp.float32)
        @ mat.astype(jnp.bfloat16).astype(jnp.float32)
    )

    assert jnp.allclose(out, ref_bf16, atol=1e-3, rtol=1e-3), "mismatch vs bf16-op reference"
    assert jnp.allclose(out, ref_f32, atol=1.5e-1, rtol=5e-2), "mismatch vs f32 reference"

    print("KERNEL_OK")
</pallas_src>

<mosaic_0001>
module attributes {stable_mosaic.version = 11 : i64} {
  func.func @sparse_model_kernel(%arg0: i32, %arg1: i32, %arg2: i32, %arg3: memref<8x128xf32, #tpu.memory_space<vmem>>, %arg4: memref<1x128xf32, #tpu.memory_space<vmem>>, %arg5: memref<128x128xbf16, #tpu.memory_space<vmem>>, %arg6: memref<8x128xf32, #tpu.memory_space<vmem>>) attributes {dimension_semantics = [#tpu.dimension_semantics<parallel>, #tpu.dimension_semantics<parallel>, #tpu.dimension_semantics<arbitrary>], iteration_bounds = array<i64: 1, 1, 1>, scalar_prefetch = 0 : i64, scratch_operands = 0 : i64, tpu.core_type = #tpu.core_type<tc>, window_params = [{transform_indices = @transform_0, window_bounds = array<i64: 8, 128>}, {transform_indices = @transform_1, window_bounds = array<i64: 1, 128>}, {transform_indices = @transform_2, window_bounds = array<i64: 128, 128>}, {transform_indices = @transform_3, window_bounds = array<i64: 8, 128>}]} {
    %c0_i32 = arith.constant 0 : i32
    %0 = arith.cmpi eq, %arg2, %c0_i32 : i32
    %1 = arith.extui %0 : i1 to i32
    %c0_i32_0 = arith.constant 0 : i32
    %2 = arith.cmpi ne, %1, %c0_i32_0 : i32
    scf.if %2 {
      %cst_11 = arith.constant 0.000000e+00 : f32
      %18 = vector.broadcast %cst_11 : f32 to vector<8x128xf32>
      %c0_12 = arith.constant 0 : index
      %c0_13 = arith.constant 0 : index
      %19 = vector.load %arg6[%c0_12, %c0_13] : memref<8x128xf32, #tpu.memory_space<vmem>>, vector<8x128xf32>
      tpu.vector_store %arg6[%c0_12, %c0_13], %18 {strides = array<i32>} : memref<8x128xf32, #tpu.memory_space<vmem>>, vector<8x128xf32>,
    } else {
    }
    %c0 = arith.constant 0 : index
    %c0_1 = arith.constant 0 : index
    %3 = vector.load %arg4[%c0, %c0_1] : memref<1x128xf32, #tpu.memory_space<vmem>>, vector<1x128xf32>
    %4 = arith.negf %3 : vector<1x128xf32>
    %5 = math.exp %4 : vector<1x128xf32>
    %cst = arith.constant 1.000000e+00 : f32
    %6 = vector.broadcast %cst : f32 to vector<1x128xf32>
    %7 = arith.addf %6, %5 : vector<1x128xf32>
    %8 = arith.divf %6, %7 : vector<1x128xf32>
    %c0_2 = arith.constant 0 : index
    %c0_3 = arith.constant 0 : index
    %9 = vector.load %arg3[%c0_2, %c0_3] : memref<8x128xf32, #tpu.memory_space<vmem>>, vector<8x128xf32>
    %10 = vector.broadcast %8 : vector<1x128xf32> to vector<8x128xf32>
    %11 = arith.mulf %9, %10 : vector<8x128xf32>
    %12 = arith.truncf %11 : vector<8x128xf32> to vector<8x128xbf16>
    %c0_4 = arith.constant 0 : index
    %c0_5 = arith.constant 0 : index
    %13 = vector.load %arg6[%c0_4, %c0_5] : memref<8x128xf32, #tpu.memory_space<vmem>>, vector<8x128xf32>
    %c0_6 = arith.constant 0 : index
    %c0_7 = arith.constant 0 : index
    %14 = vector.load %arg5[%c0_6, %c0_7] : memref<128x128xbf16, #tpu.memory_space<vmem>>, vector<128x128xbf16>
    %cst_8 = arith.constant dense<0.000000e+00> : vector<8x128xf32>
    %15 = tpu.matmul %12, %14, %cst_8 {dimension_numbers = #tpu.dot_dimension_numbers<[1], [0], [0], [1], [0, 0, 1, 1], [], []>} : vector<8x128xbf16>, vector<128x128xbf16>, vector<8x128xf32> -> vector<8x128xf32>
    %16 = arith.addf %13, %15 : vector<8x128xf32>
    %c0_9 = arith.constant 0 : index
    %c0_10 = arith.constant 0 : index
    %17 = vector.load %arg6[%c0_9, %c0_10] : memref<8x128xf32, #tpu.memory_space<vmem>>, vector<8x128xf32>
    tpu.vector_store %arg6[%c0_9, %c0_10], %16 {strides = array<i32>} : memref<8x128xf32, #tpu.memory_space<vmem>>, vector<8x128xf32>,
    return
  }
  func.func @transform_0(%arg0: i32, %arg1: i32, %arg2: i32) -> (i32, i32) {
    %c0_i32 = arith.constant 0 : i32
    return %arg0, %arg2 : i32, i32
  }
  func.func @transform_1(%arg0: i32, %arg1: i32, %arg2: i32) -> (i32, i32) {
    %c0_i32 = arith.constant 0 : i32
    %c0_i32_0 = arith.constant 0 : i32
    return %c0_i32, %arg2 : i32, i32
  }
  func.func @transform_2(%arg0: i32, %arg1: i32, %arg2: i32) -> (i32, i32) {
    %c0_i32 = arith.constant 0 : i32
    return %arg2, %arg1 : i32, i32
  }
  func.func @transform_3(%arg0: i32, %arg1: i32, %arg2: i32) -> (i32, i32) {
    %c0_i32 = arith.constant 0 : i32
    return %arg0, %arg1 : i32, i32
  }
}

</mosaic_0001>

<bundles_post_ra>
// kernel: tpu_custom_call.1
= control target key start
LH: loop header
LB: loop body
LE: loop exit
PB: predicated region body
PF: predicated region fallthrough
CT: control target
= control target key end

     0   :  { %8 = vsyncpa [#allocation3], 0  ;;  %s388_s0 = inlined_call_operand.hbm [shape: f32[8,128], index: 0, kind: input, shape index: {}]   ;;  %s389_s1 = inlined_call_operand.vmem [shape: f32[1,128], index: 1, kind: input, shape index: {}]   ;;  %s390_s2 = inlined_call_operand.hbm [shape: bf16[128,128], index: 2, kind: input, shape index: {}]   ;;  %s391_s3 = inlined_call_operand.hbm [shape: f32[8,128], index: 3, kind: output, shape index: {}]  }
   0x1   :  { %9 = vsyncpa [#allocation6], 0 }
   0x2   :  { %10 = vsyncpa [#allocation4], 0  ;;  %s315_s12 = smov [#allocation2]   ;;  %s316_s14 = smov [#allocation5]  }
   0x3   :  { %s17_s13 = sshll.u32 %s315_s12, 4  ;;  %s28_s15 = sshll.u32 %s316_s14, 4  ;;  %s18_s13 = int_to_ptr.vmem [resolvable:$true] %s17_s13  ;;  %s342_s15 = int_to_ptr.vmem [resolvable:$true] %s28_s15 }
   0x4   :  { %s243_s18 = scalar_lea.hbm %s388_s0, 128 }
   0x5   :  { %p244_p0 = scmp.ne.s32.totalorder %s388_s0, %s243_s18  ;;  %p247_p1 = scmp.lt.u32.totalorder %s243_s18, %s388_s0 }
   0x7   :  { %p249_p2 = pnand %p247_p1, %p244_p0 }
   0x9   :  { %252 = shalt.err (!%p249_p2)
}
   0xa   :  { %s253_s23 = scalar_lea.vmem %s18_s13, 128  ;;  %p258_p4 = scmp.lt.s32.totalorder %s18_s13, %s18_s13 }
   0xb   :  { %p254_p3 = scmp.ne.s32.totalorder %s18_s13, %s253_s23  ;;  %p259_p5 = scmp.lt.s32.totalorder %s253_s23, %s253_s23 }
   0xd   :  { %p260_p6 = por %p259_p5, %p258_p4 }
   0xf   :  { %p261_p7 = pnand %p260_p6, %p254_p3 }
  0x11   :  { %264 = shalt.err (!%p261_p7)
}
  0x12   :  { %20 = dma.hbm_to_vmem [thread:$0]  %s388_s0, 128, %s18_s13, [#allocation3]  }
  0x13   :  { %s265_s28 = scalar_lea.hbm %s390_s2, 1024 }
  0x14   :  { %p266_p8 = scmp.ne.s32.totalorder %s390_s2, %s265_s28  ;;  %p269_p9 = scmp.lt.u32.totalorder %s265_s28, %s390_s2 }
  0x16   :  { %p271_p10 = pnand %p269_p9, %p266_p8 }
  0x18   :  { %274 = shalt.err (!%p271_p10)
}
  0x19   :  { %s275_s6 = scalar_lea.vmem %s342_s15, 1024  ;;  %p280_p12 = scmp.lt.s32.totalorder %s342_s15, %s342_s15 }
  0x1a   :  { %p276_p11 = scmp.ne.s32.totalorder %s342_s15, %s275_s6  ;;  %p281_p13 = scmp.lt.s32.totalorder %s275_s6, %s275_s6 }
  0x1c   :  { %p282_p0 = por %p281_p13, %p280_p12 }
  0x1e   :  { %p283_p1 = pnand %p282_p0, %p276_p11 }
  0x20   :  { %286 = shalt.err (!%p283_p1)
}
  0x21   :  { %s317_s0 = smov 64   ;;  %s318_s7 = smov 4  }
  0x22   :  { %34 = dma.hbm_to_vmem [thread:$0]  %s390_s2, 1024, %s342_s15, [#allocation6], %s317_s0, %s317_s0, %s318_s7  }
  0x23   :  { %309 = dma.done.wait [#allocation3], 128  }
  0x24   :  { %310 = vsyncadd [#allocation3], 4294967168 }
  0x25   :  { %311 = dma.done.wait [#allocation6], 1024  }
  0x26   :  { %312 = vsyncadd [#allocation6], 4294966272  ;;  %v319_v0 = vmov 0.0   ;;  %vm320_vm0 = vmmov 0   ;;  %v231_v1 = vld [vmem:[#allocation5] sm:$0xff]   ;;  %v232_v2 = vld [vmem:[#allocation5 + $0x8] sm:$0xff]   ;;  %v56_v12 = vlaneseq }
  0x27   :  { %204 = vmatprep.subr.bf16.mxu0 %v319_v0  ;;  %220 = vmatprep.mubr.msk.bf16.mxu0 %vm320_vm0, %v319_v0  ;;  %v233_v3 = vld [vmem:[#allocation5 + $0x10] sm:$0xff]   ;;  %v47_v4 = vld [vmem:[%s389_s1] sm:$0x1]  ;;  %v235_v7 = vld [vmem:[#allocation5 + $0x20] sm:$0xff]   ;;  %s321_s1 = smov [#allocation7]  }
  0x28   :  { %205 = vmatpush3.bf16.msra.mxu0 %v231_v1  ;;  %v186_v5 = vmul.f32 -1.442695, %v47_v4  ;;  %v234_v6 = vld [vmem:[#allocation5 + $0x18] sm:$0xff]   ;;  %v236_v8 = vld [vmem:[#allocation5 + $0x28] sm:$0xff]   ;;  %v237_v10 = vld [vmem:[#allocation5 + $0x30] sm:$0xff]   ;;  %v57_v14 = vshrl.u32 %v56_v12, 7 }
  0x29   :  { %206 = vmatprep.subr.bf16.mxu0 %v319_v0  ;;  %v238_v13 = vld [vmem:[#allocation5 + $0x38] sm:$0xff]   ;;  %s176_s2 = sshll.u32 %s321_s1, 4  ;;  %s177_s2 = int_to_ptr.vmem [resolvable:$true] %s176_s2 }
  0x2a   :  { %239 = vpow2.f32 %v186_v5  ;;  %v58_v15 = vsub.s32 0, %v57_v14  ;;  %v54_v17 = vld [vmem:[#allocation2] sm:$0xff]  ;;  %s287_s12 = scalar_lea.vmem %s177_s2, 128  ;;  %p292_p3 = scmp.lt.s32.totalorder %s177_s2, %s177_s2 }
  0x2b   :  { %p288_p2 = scmp.ne.s32.totalorder %s177_s2, %s287_s12  ;;  %p293_p4 = scmp.lt.s32.totalorder %s287_s12, %s287_s12 }
  0x2c   :  { %207 = vmatpush3.bf16.msra.mxu0 %v232_v2 }
  0x2d   :  { %208 = vmatprep.subr.bf16.mxu0 %v319_v0  ;;  %p294_p5 = por %p293_p4, %p292_p3 }
  0x2f   :  { %p295_p6 = pnand %p294_p5, %p288_p2 }
  0x30   :  { %209 = vmatpush3.bf16.msra.mxu0 %v233_v3 }
  0x31   :  { %210 = vmatprep.subr.bf16.mxu0 %v319_v0 }
  0x34   :  { %211 = vmatpush3.bf16.msra.mxu0 %v234_v6  ;;  %v240_v9 = vpop.eup %239 }
  0x35   :  { %212 = vmatprep.subr.bf16.mxu0 %v319_v0  ;;  %v51_v11 = vadd.f32 1.0, %v240_v9 }
  0x37   :  { %241 = vrcp.f32 %v51_v11 }
  0x38   :  { %213 = vmatpush3.bf16.msra.mxu0 %v235_v7 }
  0x39   :  { %214 = vmatprep.subr.bf16.mxu0 %v319_v0 }
  0x3c   :  { %215 = vmatpush3.bf16.msra.mxu0 %v236_v8 }
  0x3d   :  { %216 = vmatprep.subr.bf16.mxu0 %v319_v0 }
  0x40   :  { %217 = vmatpush3.bf16.msra.mxu0 %v237_v10 }
  0x41   :  { %218 = vmatprep.subr.bf16.mxu0 %v319_v0  ;;  %v242_v16 = vpop.eup %241 }
  0x42   :  { %v59_v18 = vrot.slane %v242_v16, %v58_v15 }
  0x44   :  { %219 = vmatpush3.bf16.msra.mxu0 %v238_v13  ;;  %v61_v19 = vmul.f32 %v59_v18, %v54_v17 }
  0x46   :  { %v62_v20 = vpack.c.bf16 %v61_v19, %v61_v19 }
  0x48   :  { %221 = vmatmul.mubr.bf16.vlgmr.msra.gmra.mrb[0].mxu0 %v62_v20 }
 0x11b   :  { %v162_v21 = vpop.f32.mrb[0].mxu0 }
 0x11c   :  { %v222_v22 = vpop.f32.mrb[1].mxu0  ;;  %169 = vst [vmem:[#allocation7] sm:$0xff] %v162_v21 }
 0x11d   :  { %v165_v23 = vpop.f32.mrb[2].mxu0 }
 0x11e   :  { %v223_v24 = vpop.f32.mrb[3].mxu0 }
 0x11f   :  { %298 = shalt.err (!%p295_p6)
}
 0x120   :  { %s299_s15 = scalar_lea.hbm %s391_s3, 128 }
 0x121   :  { %p300_p7 = scmp.ne.s32.totalorder %s391_s3, %s299_s15  ;;  %p303_p8 = scmp.lt.u32.totalorder %s299_s15, %s391_s3 }
 0x123   :  { %p305_p9 = pnand %p303_p8, %p300_p7 }
 0x125   :  { %308 = shalt.err (!%p305_p9)
}
 0x126   :  { %179 = dma.vmem_to_hbm [thread:$0]  %s177_s2, 128, %s391_s3, [#allocation4]  }
 0x127   :  { %313 = dma.done.wait [#allocation4], 128  }
 0x128   :  { %314 = vsyncadd [#allocation4], 4294967168 }
 0x129   :  { %183 = vsyncpa [#allocation3], 1 }
 0x12a   :  { %184 = vsyncpa [#allocation6], 1 }
 0x12b   :  { %185 = vsyncpa [#allocation4], 1 }

</bundles_post_ra>
